<compile_context>
chip_gen: v7x
topology: tpu7x:2x2x1
jax: 0.10.0
libtpu: 0.0.40
codegen_flags: <defaults>
</compile_context>

<pallas_src>
import jax
import jax.numpy as jnp
from jax.experimental import pallas as pl
from jax.experimental.pallas import tpu as pltpu

# ----------------------- small synthetic configuration -----------------------
BATCH = 2
SEQ = 8
HIDDEN = 32          # stand-in for Llama3 hidden_size
VOCAB = 128          # stand-in vocab
LORA_R = 8
LORA_ALPHA = 16
LORA_SCALING = LORA_ALPHA / LORA_R
NUM_BIO = 3          # token-classification head classes
TOK_PAD = 128        # token head padded to a lane-dense 128-wide output
IGNORE_INDEX = -100
RMS_EPS = 1e-6


def _full_spec(shape):
    """BlockSpec covering the entire array as a single block (grid=(1,))."""
    return pl.BlockSpec(shape, lambda i, _n=len(shape): (0,) * _n)


# ------------------------------- fused Pallas kernel -------------------------------
def _masked_ce_sums(logits_f32, labels_col):
    """Returns (sum of per-row NLL over valid rows, #valid rows). labels_col: (N,1) int32."""
    m = jnp.max(logits_f32, axis=-1, keepdims=True)
    lse = m + jnp.log(jnp.sum(jnp.exp(logits_f32 - m), axis=-1, keepdims=True))
    col = jax.lax.broadcasted_iota(jnp.int32, logits_f32.shape, 1)
    tgt = jnp.sum(jnp.where(col == labels_col, logits_f32, 0.0), axis=-1, keepdims=True)
    valid = labels_col != IGNORE_INDEX
    per_tok = jnp.where(valid, lse - tgt, 0.0)
    return jnp.sum(per_tok), jnp.sum(valid.astype(jnp.float32))


def _fused_forward_kernel(
    h0_ref,                          # (N, H)  bf16 embedded tokens
    w1_ref, a1_ref, b1_ref,          # LoRA layer 1 (bf16)
    w2_ref, a2_ref, b2_ref,          # LoRA layer 2 (bf16)
    gamma_ref,                       # (1, H)  f32 RMSNorm weight
    lm_w_ref,                        # (H, V)  bf16 (LM head has no bias -> bias dropped)
    tok_w_ref, tok_b_ref,            # (H, TOK_PAD) / (1, TOK_PAD) bf16, zero-padded cols
    lm_labels_ref, tok_labels_ref,   # (N, 1) int32 (LM labels pre-shifted, -100 = ignore)
    lm_logits_ref,                   # out: (N, V) bf16
    tok_logits_ref,                  # out: (N, TOK_PAD) f32 (lane-dense; sliced to 3 outside)
    loss_ref,                        # out: SMEM (4,) f32 [lm_sum, lm_cnt, tok_sum, tok_cnt]
):
    x = h0_ref[...]

    # ---- LoRA linear 1 + SiLU:  y = x@W + s*(x@A)@B   (xa never leaves vregs) ----
    y1 = jnp.dot(x, w1_ref[...], preferred_element_type=jnp.float32)
    xa1 = jnp.dot(x, a1_ref[...], preferred_element_type=jnp.float32).astype(x.dtype)
    y1 = y1 + LORA_SCALING * jnp.dot(xa1, b1_ref[...], preferred_element_type=jnp.float32)
    y1 = y1 * jax.nn.sigmoid(y1)
    h1 = y1.astype(jnp.bfloat16)

    # ---- LoRA linear 2 (no activation) ----
    y2 = jnp.dot(h1, w2_ref[...], preferred_element_type=jnp.float32)
    xa2 = jnp.dot(h1, a2_ref[...], preferred_element_type=jnp.float32).astype(h1.dtype)
    y2 = y2 + LORA_SCALING * jnp.dot(xa2, b2_ref[...], preferred_element_type=jnp.float32)

    # ---- RMSNorm fused as epilogue (pure VPU/EUP work on data already in vregs) ----
    var = jnp.mean(y2 * y2, axis=-1, keepdims=True)
    h = y2 * jax.lax.rsqrt(var + RMS_EPS) * gamma_ref[...]
    h_bf = h.astype(jnp.bfloat16)            # "last_hidden_state"

    # ---- LM head (bias-free) + masked CE; loss driven from in-register f32 logits ----
    lm_logits = jnp.dot(h_bf, lm_w_ref[...], preferred_element_type=jnp.float32)
    lm_logits_ref[...] = lm_logits.astype(lm_logits_ref.dtype)
    lm_sum, lm_cnt = _masked_ce_sums(lm_logits, lm_labels_ref[...])

    # ---- token head: bf16 matmul, f32 accumulate, lane-dense padded output ----
    tok_logits = jnp.dot(h_bf, tok_w_ref[...], preferred_element_type=jnp.float32)
    tok_logits = tok_logits + tok_b_ref[...].astype(jnp.float32)
    tok_logits_ref[...] = tok_logits
    col = jax.lax.broadcasted_iota(jnp.int32, tok_logits.shape, 1)
    tok_ce_logits = jnp.where(col < NUM_BIO, tok_logits, -1e30)   # mask padded classes
    tok_sum, tok_cnt = _masked_ce_sums(tok_ce_logits, tok_labels_ref[...])

    loss_ref[0] = lm_sum
    loss_ref[1] = lm_cnt
    loss_ref[2] = tok_sum
    loss_ref[3] = tok_cnt


def fused_forward(h0, w1, a1, b1, w2, a2, b2, gamma, lm_w, tok_w, tok_b,
                  lm_labels, tok_labels):
    n = h0.shape[0]
    args = (h0, w1, a1, b1, w2, a2, b2, gamma, lm_w, tok_w, tok_b, lm_labels, tok_labels)
    # TODO(synk): at real 8B / 128k-vocab scale replace these full-array blocks with a
    # (token x vocab) grid + flash-style online CE over vocab tiles (never materializing
    # the logits slab), reduction-last "arbitrary" K axis with a pl.when-guarded f32
    # accumulator, a "parallel" token axis for v7x's 2 TensorCores, (8,128)-multiple
    # tiles, and explicit vmem_limit_bytes sized for v7x's 64 MiB VMEM.
    return pl.pallas_call(
        _fused_forward_kernel,
        grid=(1,),
        in_specs=[_full_spec(a.shape) for a in args],
        out_specs=(
            _full_spec((n, VOCAB)),
            _full_spec((n, TOK_PAD)),
            pl.BlockSpec(memory_space=pltpu.MemorySpace.SMEM),
        ),
        out_shape=(
            jax.ShapeDtypeStruct((n, VOCAB), jnp.bfloat16),
            jax.ShapeDtypeStruct((n, TOK_PAD), jnp.float32),
            jax.ShapeDtypeStruct((4,), jnp.float32),
        ),
        compiler_params=pltpu.CompilerParams(dimension_semantics=("arbitrary",)),
    )(*args)


# ----------------------------- params & wrapper --------------------------------
def init_params(key):
    ks = jax.random.split(key, 10)
    bf = jnp.bfloat16
    p = {}
    p["embed"] = (0.02 * jax.random.normal(ks[0], (VOCAB, HIDDEN))).astype(bf)
    # Two LoRA-adapted linear layers (synthetic backbone). Real LoRA inits B=0; small
    # randoms are used so the LoRA branch is numerically exercised.
    p["w1"] = (0.05 * jax.random.normal(ks[1], (HIDDEN, HIDDEN))).astype(bf)
    p["a1"] = (0.05 * jax.random.normal(ks[2], (HIDDEN, LORA_R))).astype(bf)
    p["b1"] = (0.05 * jax.random.normal(ks[3], (LORA_R, HIDDEN))).astype(bf)
    p["w2"] = (0.05 * jax.random.normal(ks[4], (HIDDEN, HIDDEN))).astype(bf)
    p["a2"] = (0.05 * jax.random.normal(ks[5], (HIDDEN, LORA_R))).astype(bf)
    p["b2"] = (0.05 * jax.random.normal(ks[6], (LORA_R, HIDDEN))).astype(bf)
    p["norm_gamma"] = jnp.ones((1, HIDDEN), jnp.float32)
    p["lm_w"] = (0.05 * jax.random.normal(ks[7], (HIDDEN, VOCAB))).astype(bf)
    # LM head bias is zero in Llama -> dropped entirely (perf feedback).
    # Token head stored in bf16 (MXU-native) and zero-padded to a lane-dense 128 width;
    # the real classes are the first NUM_BIO columns.
    tok_w = 0.05 * jax.random.normal(ks[8], (HIDDEN, NUM_BIO))
    tok_b = 0.05 * jax.random.normal(ks[9], (1, NUM_BIO))
    p["tok_w"] = jnp.pad(tok_w, ((0, 0), (0, TOK_PAD - NUM_BIO))).astype(bf)
    p["tok_b"] = jnp.pad(tok_b, ((0, 0), (0, TOK_PAD - NUM_BIO))).astype(bf)
    return p


def forward(params, input_ids, attention_mask, labels, token_labels):
    """Mirrors UnslothLoRANER.forward (training path with labels + token_labels)."""
    del attention_mask  # TODO(synk): the 8B Llama self-attention / attention_mask is not
    # reproduced (synthetic LoRA-MLP backbone); padding enters via the -100 labels.
    B, S = input_ids.shape
    n = B * S
    h0 = params["embed"][input_ids].reshape(n, HIDDEN)   # embedding gather (plain-JAX glue)

    # Causal shift applied to the *labels* (cheap int ops) instead of slicing the logits:
    # row i is trained against labels[i+1]; the last position of each sequence is ignored.
    lm_labels = jnp.concatenate(
        [labels[:, 1:], jnp.full((B, 1), IGNORE_INDEX, labels.dtype)], axis=1
    ).reshape(n, 1).astype(jnp.int32)
    tok_labels = token_labels.reshape(n, 1).astype(jnp.int32)

    lm_logits_flat, tok_logits_pad, sums = fused_forward(
        h0, params["w1"], params["a1"], params["b1"],
        params["w2"], params["a2"], params["b2"],
        params["norm_gamma"], params["lm_w"], params["tok_w"], params["tok_b"],
        lm_labels, tok_labels)

    # Mean over valid rows; count guarded with max(.,1) (PyTorch CrossEntropyLoss would
    # return NaN if every label == -100 — documented semantic divergence).
    causal_lm_loss = sums[0] / jnp.maximum(sums[1], 1.0)
    token_head_loss = sums[2] / jnp.maximum(sums[3], 1.0)
    total_loss = causal_lm_loss + token_head_loss

    lm_logits = lm_logits_flat.reshape(B, S, VOCAB)
    token_logits = tok_logits_pad[:, :NUM_BIO].reshape(B, S, NUM_BIO)
    return {
        "loss": total_loss,
        "logits": lm_logits,
        "causal_lm_loss": causal_lm_loss,
        "token_head_loss": token_head_loss,
        "token_logits": token_logits,
    }


# ----------------------------- pure-JAX reference (sanity) ---------------------
def _reference_forward(params, input_ids, labels, token_labels):
    """Pure-JAX mirror of the fused kernel's math (same dtype flow)."""
    B, S = input_ids.shape
    n = B * S
    x = params["embed"][input_ids].reshape(n, HIDDEN)

    def lora(x_, w, a, b):
        y = jnp.dot(x_, w, preferred_element_type=jnp.float32)
        xa = jnp.dot(x_, a, preferred_element_type=jnp.float32).astype(x_.dtype)
        return y + LORA_SCALING * jnp.dot(xa, b, preferred_element_type=jnp.float32)

    y1 = lora(x, params["w1"], params["a1"], params["b1"])
    y1 = y1 * jax.nn.sigmoid(y1)
    h1 = y1.astype(jnp.bfloat16)
    y2 = lora(h1, params["w2"], params["a2"], params["b2"])
    var = jnp.mean(y2 * y2, axis=-1, keepdims=True)
    h = (y2 * jax.lax.rsqrt(var + RMS_EPS) * params["norm_gamma"]).astype(jnp.bfloat16)

    lm_logits = jnp.dot(h, params["lm_w"], preferred_element_type=jnp.float32)
    tok_logits = jnp.dot(h, params["tok_w"], preferred_element_type=jnp.float32)
    tok_logits = tok_logits + params["tok_b"].astype(jnp.float32)

    def ce(logits, lab):
        lse = jax.nn.logsumexp(logits, axis=-1)
        tgt = jnp.take_along_axis(logits, jnp.maximum(lab, 0)[:, None], axis=-1)[:, 0]
        valid = lab != IGNORE_INDEX
        return jnp.sum(jnp.where(valid, lse - tgt, 0.0)) / jnp.maximum(valid.sum(), 1)

    lm_lab = jnp.concatenate(
        [labels[:, 1:], jnp.full((B, 1), IGNORE_INDEX, labels.dtype)], axis=1
    ).reshape(n).astype(jnp.int32)
    tok_lab = token_labels.reshape(n).astype(jnp.int32)
    lm_loss = ce(lm_logits, lm_lab)
    tok_ce_logits = jnp.where(jnp.arange(TOK_PAD)[None, :] < NUM_BIO, tok_logits, -1e30)
    tok_loss = ce(tok_ce_logits, tok_lab)
    return lm_loss + tok_loss


# ------------------------------------- main -------------------------------------
if __name__ == "__main__":
    key = jax.random.PRNGKey(0)
    pkey, dkey = jax.random.split(key)
    params = init_params(pkey)

    k1, k2 = jax.random.split(dkey)
    input_ids = jax.random.randint(k1, (BATCH, SEQ), 0, VOCAB, dtype=jnp.int32)
    attention_mask = jnp.ones((BATCH, SEQ), jnp.int32).at[1, SEQ - 2:].set(0)
    labels = jnp.where(attention_mask == 1, input_ids, IGNORE_INDEX).astype(jnp.int32)
    token_labels = jax.random.randint(k2, (BATCH, SEQ), 0, NUM_BIO, dtype=jnp.int32)
    token_labels = jnp.where(attention_mask == 1, token_labels, IGNORE_INDEX).astype(jnp.int32)

    out = jax.jit(forward)(params, input_ids, attention_mask, labels, token_labels)
    jax.block_until_ready(out)

    assert out["logits"].shape == (BATCH, SEQ, VOCAB)
    assert out["token_logits"].shape == (BATCH, SEQ, NUM_BIO)
    assert bool(jnp.isfinite(out["loss"])), "non-finite loss"

    # sanity: fused-kernel loss matches a pure-JAX reference of the same math
    ref_total = jax.jit(_reference_forward)(params, input_ids, labels, token_labels)
    assert abs(float(out["loss"]) - float(ref_total)) < 5e-2, (
        float(out["loss"]), float(ref_total))

    print("KERNEL_OK")
</pallas_src>

<mosaic_0001>
module attributes {stable_mosaic.version = 11 : i64} {
  func.func @_fused_forward_kernel(%arg0: i32, %arg1: memref<16x32xbf16, #tpu.memory_space<vmem>>, %arg2: memref<32x32xbf16, #tpu.memory_space<vmem>>, %arg3: memref<32x8xbf16, #tpu.memory_space<vmem>>, %arg4: memref<8x32xbf16, #tpu.memory_space<vmem>>, %arg5: memref<32x32xbf16, #tpu.memory_space<vmem>>, %arg6: memref<32x8xbf16, #tpu.memory_space<vmem>>, %arg7: memref<8x32xbf16, #tpu.memory_space<vmem>>, %arg8: memref<1x32xf32, #tpu.memory_space<vmem>>, %arg9: memref<32x128xbf16, #tpu.memory_space<vmem>>, %arg10: memref<32x128xbf16, #tpu.memory_space<vmem>>, %arg11: memref<1x128xbf16, #tpu.memory_space<vmem>>, %arg12: memref<16x1xi32, #tpu.memory_space<vmem>>, %arg13: memref<16x1xi32, #tpu.memory_space<vmem>>, %arg14: memref<16x128xbf16, #tpu.memory_space<vmem>>, %arg15: memref<16x128xf32, #tpu.memory_space<vmem>>, %arg16: memref<4xf32, #tpu.memory_space<smem>>) attributes {dimension_semantics = [#tpu.dimension_semantics<arbitrary>], iteration_bounds = array<i64: 1>, scalar_prefetch = 0 : i64, scratch_operands = 0 : i64, tpu.core_type = #tpu.core_type<tc>, window_params = [{pipeline_mode = #tpu.pipeline_mode<synchronous>, transform_indices = @transform_0, window_bounds = array<i64: 16, 32>}, {pipeline_mode = #tpu.pipeline_mode<synchronous>, transform_indices = @transform_1, window_bounds = array<i64: 32, 32>}, {pipeline_mode = #tpu.pipeline_mode<synchronous>, transform_indices = @transform_2, window_bounds = array<i64: 32, 8>}, {pipeline_mode = #tpu.pipeline_mode<synchronous>, transform_indices = @transform_3, window_bounds = array<i64: 8, 32>}, {pipeline_mode = #tpu.pipeline_mode<synchronous>, transform_indices = @transform_4, window_bounds = array<i64: 32, 32>}, {pipeline_mode = #tpu.pipeline_mode<synchronous>, transform_indices = @transform_5, window_bounds = array<i64: 32, 8>}, {pipeline_mode = #tpu.pipeline_mode<synchronous>, transform_indices = @transform_6, window_bounds = array<i64: 8, 32>}, {pipeline_mode = #tpu.pipeline_mode<synchronous>, transform_indices = @transform_7, window_bounds = array<i64: 1, 32>}, {pipeline_mode = #tpu.pipeline_mode<synchronous>, transform_indices = @transform_8, window_bounds = array<i64: 32, 128>}, {pipeline_mode = #tpu.pipeline_mode<synchronous>, transform_indices = @transform_9, window_bounds = array<i64: 32, 128>}, {pipeline_mode = #tpu.pipeline_mode<synchronous>, transform_indices = @transform_10, window_bounds = array<i64: 1, 128>}, {pipeline_mode = #tpu.pipeline_mode<synchronous>, transform_indices = @transform_11, window_bounds = array<i64: 16, 1>}, {pipeline_mode = #tpu.pipeline_mode<synchronous>, transform_indices = @transform_12, window_bounds = array<i64: 16, 1>}, {pipeline_mode = #tpu.pipeline_mode<synchronous>, transform_indices = @transform_13, window_bounds = array<i64: 16, 128>}, {pipeline_mode = #tpu.pipeline_mode<synchronous>, transform_indices = @transform_14, window_bounds = array<i64: 16, 128>}, {transform_indices = @transform_15, window_bounds = array<i64: 4>}]} {
    %c0 = arith.constant 0 : index
    %c0_0 = arith.constant 0 : index
    %0 = vector.load %arg1[%c0, %c0_0] : memref<16x32xbf16, #tpu.memory_space<vmem>>, vector<16x32xbf16>
    %c0_1 = arith.constant 0 : index
    %c0_2 = arith.constant 0 : index
    %1 = vector.load %arg2[%c0_1, %c0_2] : memref<32x32xbf16, #tpu.memory_space<vmem>>, vector<32x32xbf16>
    %cst = arith.constant dense<0.000000e+00> : vector<16x32xf32>
    %2 = tpu.matmul %0, %1, %cst {dimension_numbers = #tpu.dot_dimension_numbers<[1], [0], [0], [1], [0, 0, 1, 1], [], []>} : vector<16x32xbf16>, vector<32x32xbf16>, vector<16x32xf32> -> vector<16x32xf32>
    %c0_3 = arith.constant 0 : index
    %c0_4 = arith.constant 0 : index
    %3 = vector.load %arg3[%c0_3, %c0_4] : memref<32x8xbf16, #tpu.memory_space<vmem>>, vector<32x8xbf16>
    %cst_5 = arith.constant dense<0.000000e+00> : vector<16x8xf32>
    %4 = tpu.matmul %0, %3, %cst_5 {dimension_numbers = #tpu.dot_dimension_numbers<[1], [0], [0], [1], [0, 0, 1, 1], [], []>} : vector<16x32xbf16>, vector<32x8xbf16>, vector<16x8xf32> -> vector<16x8xf32>
    %5 = arith.truncf %4 : vector<16x8xf32> to vector<16x8xbf16>
    %c0_6 = arith.constant 0 : index
    %c0_7 = arith.constant 0 : index
    %6 = vector.load %arg4[%c0_6, %c0_7] : memref<8x32xbf16, #tpu.memory_space<vmem>>, vector<8x32xbf16>
    %cst_8 = arith.constant dense<0.000000e+00> : vector<16x32xf32>
    %7 = tpu.matmul %5, %6, %cst_8 {dimension_numbers = #tpu.dot_dimension_numbers<[1], [0], [0], [1], [0, 0, 1, 1], [], []>} : vector<16x8xbf16>, vector<8x32xbf16>, vector<16x32xf32> -> vector<16x32xf32>
    %cst_9 = arith.constant 2.000000e+00 : f32
    %8 = vector.broadcast %cst_9 : f32 to vector<16x32xf32>
    %9 = arith.mulf %8, %7 : vector<16x32xf32>
    %10 = arith.addf %2, %9 : vector<16x32xf32>
    %11 = arith.negf %10 : vector<16x32xf32>
    %12 = math.exp %11 : vector<16x32xf32>
    %cst_10 = arith.constant 1.000000e+00 : f32
    %13 = vector.broadcast %cst_10 : f32 to vector<16x32xf32>
    %14 = arith.addf %13, %12 : vector<16x32xf32>
    %15 = arith.divf %13, %14 : vector<16x32xf32>
    %16 = arith.mulf %10, %15 : vector<16x32xf32>
    %17 = arith.truncf %16 : vector<16x32xf32> to vector<16x32xbf16>
    %c0_11 = arith.constant 0 : index
    %c0_12 = arith.constant 0 : index
    %18 = vector.load %arg5[%c0_11, %c0_12] : memref<32x32xbf16, #tpu.memory_space<vmem>>, vector<32x32xbf16>
    %cst_13 = arith.constant dense<0.000000e+00> : vector<16x32xf32>
    %19 = tpu.matmul %17, %18, %cst_13 {dimension_numbers = #tpu.dot_dimension_numbers<[1], [0], [0], [1], [0, 0, 1, 1], [], []>} : vector<16x32xbf16>, vector<32x32xbf16>, vector<16x32xf32> -> vector<16x32xf32>
    %c0_14 = arith.constant 0 : index
    %c0_15 = arith.constant 0 : index
    %20 = vector.load %arg6[%c0_14, %c0_15] : memref<32x8xbf16, #tpu.memory_space<vmem>>, vector<32x8xbf16>
    %cst_16 = arith.constant dense<0.000000e+00> : vector<16x8xf32>
    %21 = tpu.matmul %17, %20, %cst_16 {dimension_numbers = #tpu.dot_dimension_numbers<[1], [0], [0], [1], [0, 0, 1, 1], [], []>} : vector<16x32xbf16>, vector<32x8xbf16>, vector<16x8xf32> -> vector<16x8xf32>
    %22 = arith.truncf %21 : vector<16x8xf32> to vector<16x8xbf16>
    %c0_17 = arith.constant 0 : index
    %c0_18 = arith.constant 0 : index
    %23 = vector.load %arg7[%c0_17, %c0_18] : memref<8x32xbf16, #tpu.memory_space<vmem>>, vector<8x32xbf16>
    %cst_19 = arith.constant dense<0.000000e+00> : vector<16x32xf32>
    %24 = tpu.matmul %22, %23, %cst_19 {dimension_numbers = #tpu.dot_dimension_numbers<[1], [0], [0], [1], [0, 0, 1, 1], [], []>} : vector<16x8xbf16>, vector<8x32xbf16>, vector<16x32xf32> -> vector<16x32xf32>
    %cst_20 = arith.constant 2.000000e+00 : f32
    %25 = vector.broadcast %cst_20 : f32 to vector<16x32xf32>
    %26 = arith.mulf %25, %24 : vector<16x32xf32>
    %27 = arith.addf %19, %26 : vector<16x32xf32>
    %28 = arith.mulf %27, %27 : vector<16x32xf32>
    %cst_21 = arith.constant dense<0.000000e+00> : vector<16xf32>
    %29 = vector.multi_reduction <add>, %28, %cst_21 [1] : vector<16x32xf32> to vector<16xf32>
    %30 = vector.shape_cast %29 : vector<16xf32> to vector<16x1xf32>
    %cst_22 = arith.constant 3.200000e+01 : f32
    %31 = vector.broadcast %cst_22 : f32 to vector<16x1xf32>
    %32 = arith.divf %30, %31 : vector<16x1xf32>
    %cst_23 = arith.constant 9.99999997E-7 : f32
    %33 = vector.broadcast %cst_23 : f32 to vector<16x1xf32>
    %34 = arith.addf %32, %33 : vector<16x1xf32>
    %35 = math.rsqrt %34 : vector<16x1xf32>
    %36 = vector.broadcast %35 : vector<16x1xf32> to vector<16x32xf32>
    %37 = arith.mulf %27, %36 : vector<16x32xf32>
    %c0_24 = arith.constant 0 : index
    %c0_25 = arith.constant 0 : index
    %38 = vector.load %arg8[%c0_24, %c0_25] : memref<1x32xf32, #tpu.memory_space<vmem>>, vector<1x32xf32>
    %39 = vector.broadcast %38 : vector<1x32xf32> to vector<16x32xf32>
    %40 = arith.mulf %37, %39 : vector<16x32xf32>
    %41 = arith.truncf %40 : vector<16x32xf32> to vector<16x32xbf16>
    %c0_26 = arith.constant 0 : index
    %c0_27 = arith.constant 0 : index
    %42 = vector.load %arg9[%c0_26, %c0_27] : memref<32x128xbf16, #tpu.memory_space<vmem>>, vector<32x128xbf16>
    %cst_28 = arith.constant dense<0.000000e+00> : vector<16x128xf32>
    %43 = tpu.matmul %41, %42, %cst_28 {dimension_numbers = #tpu.dot_dimension_numbers<[1], [0], [0], [1], [0, 0, 1, 1], [], []>} : vector<16x32xbf16>, vector<32x128xbf16>, vector<16x128xf32> -> vector<16x128xf32>
    %44 = arith.truncf %43 : vector<16x128xf32> to vector<16x128xbf16>
    %c0_29 = arith.constant 0 : index
    %c0_30 = arith.constant 0 : index
    %45 = vector.load %arg14[%c0_29, %c0_30] : memref<16x128xbf16, #tpu.memory_space<vmem>>, vector<16x128xbf16>
    tpu.vector_store %arg14[%c0_29, %c0_30], %44 {strides = array<i32>} : memref<16x128xbf16, #tpu.memory_space<vmem>>, vector<16x128xbf16>,
    %c0_31 = arith.constant 0 : index
    %c0_32 = arith.constant 0 : index
    %46 = vector.load %arg12[%c0_31, %c0_32] : memref<16x1xi32, #tpu.memory_space<vmem>>, vector<16x1xi32>
    %cst_33 = arith.constant dense<0xFF800000> : vector<16xf32>
    %47 = vector.multi_reduction <maximumf>, %43, %cst_33 [1] : vector<16x128xf32> to vector<16xf32>
    %48 = vector.shape_cast %47 : vector<16xf32> to vector<16x1xf32>
    %49 = vector.broadcast %48 : vector<16x1xf32> to vector<16x128xf32>
    %50 = arith.subf %43, %49 : vector<16x128xf32>
    %51 = math.exp %50 : vector<16x128xf32>
    %cst_34 = arith.constant dense<0.000000e+00> : vector<16xf32>
    %52 = vector.multi_reduction <add>, %51, %cst_34 [1] : vector<16x128xf32> to vector<16xf32>
    %53 = vector.shape_cast %52 : vector<16xf32> to vector<16x1xf32>
    %54 = math.log %53 : vector<16x1xf32>
    %55 = arith.addf %48, %54 : vector<16x1xf32>
    %56 = tpu.iota {dimensions = array<i32: 1>} : vector<16x128xi32>
    %57 = vector.broadcast %46 : vector<16x1xi32> to vector<16x128xi32>
    %58 = arith.cmpi eq, %56, %57 : vector<16x128xi32>
    %cst_35 = arith.constant 0.000000e+00 : f32
    %59 = vector.broadcast %cst_35 : f32 to vector<16x128xf32>
    %60 = arith.select %58, %43, %59 : vector<16x128xi1>, vector<16x128xf32>
    %cst_36 = arith.constant dense<0.000000e+00> : vector<16xf32>
    %61 = vector.multi_reduction <add>, %60, %cst_36 [1] : vector<16x128xf32> to vector<16xf32>
    %62 = vector.shape_cast %61 : vector<16xf32> to vector<16x1xf32>
    %c-100_i32 = arith.constant -100 : i32
    %63 = vector.broadcast %c-100_i32 : i32 to vector<16x1xi32>
    %64 = arith.cmpi ne, %46, %63 : vector<16x1xi32>
    %65 = arith.subf %55, %62 : vector<16x1xf32>
    %cst_37 = arith.constant 0.000000e+00 : f32
    %66 = vector.broadcast %cst_37 : f32 to vector<16x1xf32>
    %67 = arith.select %64, %65, %66 : vector<16x1xi1>, vector<16x1xf32>
    %68 = vector.shape_cast %67 : vector<16x1xf32> to vector<1x16x1xf32>
    %cst_38 = arith.constant dense<0.000000e+00> : vector<1xf32>
    %69 = vector.multi_reduction <add>, %68, %cst_38 [1, 2] : vector<1x16x1xf32> to vector<1xf32>
    %70 = vector.shape_cast %69 : vector<1xf32> to vector<1x1x1xf32>
    %71 = vector.extract %70[0, 0, 0] : f32 from vector<1x1x1xf32>
    %72 = arith.extui %64 : vector<16x1xi1> to vector<16x1xi32>
    %73 = arith.sitofp %72 : vector<16x1xi32> to vector<16x1xf32>
    %74 = vector.shape_cast %73 : vector<16x1xf32> to vector<1x16x1xf32>
    %cst_39 = arith.constant dense<0.000000e+00> : vector<1xf32>
    %75 = vector.multi_reduction <add>, %74, %cst_39 [1, 2] : vector<1x16x1xf32> to vector<1xf32>
    %76 = vector.shape_cast %75 : vector<1xf32> to vector<1x1x1xf32>
    %77 = vector.extract %76[0, 0, 0] : f32 from vector<1x1x1xf32>
    %c0_40 = arith.constant 0 : index
    %c0_41 = arith.constant 0 : index
    %78 = vector.load %arg10[%c0_40, %c0_41] : memref<32x128xbf16, #tpu.memory_space<vmem>>, vector<32x128xbf16>
    %cst_42 = arith.constant dense<0.000000e+00> : vector<16x128xf32>
    %79 = tpu.matmul %41, %78, %cst_42 {dimension_numbers = #tpu.dot_dimension_numbers<[1], [0], [0], [1], [0, 0, 1, 1], [], []>} : vector<16x32xbf16>, vector<32x128xbf16>, vector<16x128xf32> -> vector<16x128xf32>
    %c0_43 = arith.constant 0 : index
    %c0_44 = arith.constant 0 : index
    %80 = vector.load %arg11[%c0_43, %c0_44] : memref<1x128xbf16, #tpu.memory_space<vmem>>, vector<1x128xbf16>
    %81 = arith.extf %80 : vector<1x128xbf16> to vector<1x128xf32>
    %82 = vector.broadcast %81 : vector<1x128xf32> to vector<16x128xf32>
    %83 = arith.addf %79, %82 : vector<16x128xf32>
    %c0_45 = arith.constant 0 : index
    %c0_46 = arith.constant 0 : index
    %84 = vector.load %arg15[%c0_45, %c0_46] : memref<16x128xf32, #tpu.memory_space<vmem>>, vector<16x128xf32>
    tpu.vector_store %arg15[%c0_45, %c0_46], %83 {strides = array<i32>} : memref<16x128xf32, #tpu.memory_space<vmem>>, vector<16x128xf32>,
    %85 = tpu.iota {dimensions = array<i32: 1>} : vector<16x128xi32>
    %c3_i32 = arith.constant 3 : i32
    %86 = vector.broadcast %c3_i32 : i32 to vector<16x128xi32>
    %87 = arith.cmpi slt, %85, %86 : vector<16x128xi32>
    %cst_47 = arith.constant -1.000000e+30 : f32
    %88 = vector.broadcast %cst_47 : f32 to vector<16x128xf32>
    %89 = arith.select %87, %83, %88 : vector<16x128xi1>, vector<16x128xf32>
    %c0_48 = arith.constant 0 : index
    %c0_49 = arith.constant 0 : index
    %90 = vector.load %arg13[%c0_48, %c0_49] : memref<16x1xi32, #tpu.memory_space<vmem>>, vector<16x1xi32>
    %cst_50 = arith.constant dense<0xFF800000> : vector<16xf32>
    %91 = vector.multi_reduction <maximumf>, %89, %cst_50 [1] : vector<16x128xf32> to vector<16xf32>
    %92 = vector.shape_cast %91 : vector<16xf32> to vector<16x1xf32>
    %93 = vector.broadcast %92 : vector<16x1xf32> to vector<16x128xf32>
    %94 = arith.subf %89, %93 : vector<16x128xf32>
    %95 = math.exp %94 : vector<16x128xf32>
    %cst_51 = arith.constant dense<0.000000e+00> : vector<16xf32>
    %96 = vector.multi_reduction <add>, %95, %cst_51 [1] : vector<16x128xf32> to vector<16xf32>
    %97 = vector.shape_cast %96 : vector<16xf32> to vector<16x1xf32>
    %98 = math.log %97 : vector<16x1xf32>
    %99 = arith.addf %92, %98 : vector<16x1xf32>
    %100 = tpu.iota {dimensions = array<i32: 1>} : vector<16x128xi32>
    %101 = vector.broadcast %90 : vector<16x1xi32> to vector<16x128xi32>
    %102 = arith.cmpi eq, %100, %101 : vector<16x128xi32>
    %cst_52 = arith.constant 0.000000e+00 : f32
    %103 = vector.broadcast %cst_52 : f32 to vector<16x128xf32>
    %104 = arith.select %102, %89, %103 : vector<16x128xi1>, vector<16x128xf32>
    %cst_53 = arith.constant dense<0.000000e+00> : vector<16xf32>
    %105 = vector.multi_reduction <add>, %104, %cst_53 [1] : vector<16x128xf32> to vector<16xf32>
    %106 = vector.shape_cast %105 : vector<16xf32> to vector<16x1xf32>
    %c-100_i32_54 = arith.constant -100 : i32
    %107 = vector.broadcast %c-100_i32_54 : i32 to vector<16x1xi32>
    %108 = arith.cmpi ne, %90, %107 : vector<16x1xi32>
    %109 = arith.subf %99, %106 : vector<16x1xf32>
    %cst_55 = arith.constant 0.000000e+00 : f32
    %110 = vector.broadcast %cst_55 : f32 to vector<16x1xf32>
    %111 = arith.select %108, %109, %110 : vector<16x1xi1>, vector<16x1xf32>
    %112 = vector.shape_cast %111 : vector<16x1xf32> to vector<1x16x1xf32>
    %cst_56 = arith.constant dense<0.000000e+00> : vector<1xf32>
    %113 = vector.multi_reduction <add>, %112, %cst_56 [1, 2] : vector<1x16x1xf32> to vector<1xf32>
    %114 = vector.shape_cast %113 : vector<1xf32> to vector<1x1x1xf32>
    %115 = vector.extract %114[0, 0, 0] : f32 from vector<1x1x1xf32>
    %116 = arith.extui %108 : vector<16x1xi1> to vector<16x1xi32>
    %117 = arith.sitofp %116 : vector<16x1xi32> to vector<16x1xf32>
    %118 = vector.shape_cast %117 : vector<16x1xf32> to vector<1x16x1xf32>
    %cst_57 = arith.constant dense<0.000000e+00> : vector<1xf32>
    %119 = vector.multi_reduction <add>, %118, %cst_57 [1, 2] : vector<1x16x1xf32> to vector<1xf32>
    %120 = vector.shape_cast %119 : vector<1xf32> to vector<1x1x1xf32>
    %121 = vector.extract %120[0, 0, 0] : f32 from vector<1x1x1xf32>
    %c0_58 = arith.constant 0 : index
    %122 = memref.load %arg16[%c0_58] : memref<4xf32, #tpu.memory_space<smem>>
    memref.store %71, %arg16[%c0_58] : memref<4xf32, #tpu.memory_space<smem>>
    %c1 = arith.constant 1 : index
    %123 = memref.load %arg16[%c1] : memref<4xf32, #tpu.memory_space<smem>>
    memref.store %77, %arg16[%c1] : memref<4xf32, #tpu.memory_space<smem>>
    %c2 = arith.constant 2 : index
    %124 = memref.load %arg16[%c2] : memref<4xf32, #tpu.memory_space<smem>>
    memref.store %115, %arg16[%c2] : memref<4xf32, #tpu.memory_space<smem>>
    %c3 = arith.constant 3 : index
    %125 = memref.load %arg16[%c3] : memref<4xf32, #tpu.memory_space<smem>>
    memref.store %121, %arg16[%c3] : memref<4xf32, #tpu.memory_space<smem>>
    return
  }
  func.func @transform_0(%arg0: i32) -> (i32, i32) {
    %c0_i32 = arith.constant 0 : i32
    %c0_i32_0 = arith.constant 0 : i32
    %c0_i32_1 = arith.constant 0 : i32
    return %c0_i32, %c0_i32_0 : i32, i32
  }
  func.func @transform_1(%arg0: i32) -> (i32, i32) {
    %c0_i32 = arith.constant 0 : i32
    %c0_i32_0 = arith.constant 0 : i32
    %c0_i32_1 = arith.constant 0 : i32
    return %c0_i32, %c0_i32_0 : i32, i32
  }
  func.func @transform_2(%arg0: i32) -> (i32, i32) {
    %c0_i32 = arith.constant 0 : i32
    %c0_i32_0 = arith.constant 0 : i32
    %c0_i32_1 = arith.constant 0 : i32
    return %c0_i32, %c0_i32_0 : i32, i32
  }
  func.func @transform_3(%arg0: i32) -> (i32, i32) {
    %c0_i32 = arith.constant 0 : i32
    %c0_i32_0 = arith.constant 0 : i32
    %c0_i32_1 = arith.constant 0 : i32
    return %c0_i32, %c0_i32_0 : i32, i32
  }
  func.func @transform_4(%arg0: i32) -> (i32, i32) {
    %c0_i32 = arith.constant 0 : i32
    %c0_i32_0 = arith.constant 0 : i32
    %c0_i32_1 = arith.constant 0 : i32
    return %c0_i32, %c0_i32_0 : i32, i32
  }
  func.func @transform_5(%arg0: i32) -> (i32, i32) {
    %c0_i32 = arith.constant 0 : i32
    %c0_i32_0 = arith.constant 0 : i32
    %c0_i32_1 = arith.constant 0 : i32
    return %c0_i32, %c0_i32_0 : i32, i32
  }
  func.func @transform_6(%arg0: i32) -> (i32, i32) {
    %c0_i32 = arith.constant 0 : i32
    %c0_i32_0 = arith.constant 0 : i32
    %c0_i32_1 = arith.constant 0 : i32
    return %c0_i32, %c0_i32_0 : i32, i32
  }
  func.func @transform_7(%arg0: i32) -> (i32, i32) {
    %c0_i32 = arith.constant 0 : i32
    %c0_i32_0 = arith.constant 0 : i32
    %c0_i32_1 = arith.constant 0 : i32
    return %c0_i32, %c0_i32_0 : i32, i32
  }
  func.func @transform_8(%arg0: i32) -> (i32, i32) {
    %c0_i32 = arith.constant 0 : i32
    %c0_i32_0 = arith.constant 0 : i32
    %c0_i32_1 = arith.constant 0 : i32
    return %c0_i32, %c0_i32_0 : i32, i32
  }
  func.func @transform_9(%arg0: i32) -> (i32, i32) {
    %c0_i32 = arith.constant 0 : i32
    %c0_i32_0 = arith.constant 0 : i32
    %c0_i32_1 = arith.constant 0 : i32
    return %c0_i32, %c0_i32_0 : i32, i32
  }
  func.func @transform_10(%arg0: i32) -> (i32, i32) {
    %c0_i32 = arith.constant 0 : i32
    %c0_i32_0 = arith.constant 0 : i32
    %c0_i32_1 = arith.constant 0 : i32
    return %c0_i32, %c0_i32_0 : i32, i32
  }
  func.func @transform_11(%arg0: i32) -> (i32, i32) {
    %c0_i32 = arith.constant 0 : i32
    %c0_i32_0 = arith.constant 0 : i32
    %c0_i32_1 = arith.constant 0 : i32
    return %c0_i32, %c0_i32_0 : i32, i32
  }
  func.func @transform_12(%arg0: i32) -> (i32, i32) {
    %c0_i32 = arith.constant 0 : i32
    %c0_i32_0 = arith.constant 0 : i32
    %c0_i32_1 = arith.constant 0 : i32
    return %c0_i32, %c0_i32_0 : i32, i32
  }
  func.func @transform_13(%arg0: i32) -> (i32, i32) {
    %c0_i32 = arith.constant 0 : i32
    %c0_i32_0 = arith.constant 0 : i32
    %c0_i32_1 = arith.constant 0 : i32
    return %c0_i32, %c0_i32_0 : i32, i32
  }
  func.func @transform_14(%arg0: i32) -> (i32, i32) {
    %c0_i32 = arith.constant 0 : i32
    %c0_i32_0 = arith.constant 0 : i32
    %c0_i32_1 = arith.constant 0 : i32
    return %c0_i32, %c0_i32_0 : i32, i32
  }
  func.func @transform_15(%arg0: i32) -> i32 {
    %c0_i32 = arith.constant 0 : i32
    %c0_i32_0 = arith.constant 0 : i32
    return %c0_i32 : i32
  }
}

</mosaic_0001>

<bundles_post_ra>
// kernel: forward.1
= control target key start
LH: loop header
LB: loop body
LE: loop exit
PB: predicated region body
PF: predicated region fallthrough
CT: control target
= control target key end

     0   :  { %21 = vsyncpa [#allocation3], 0  ;;  %v977_v1 = vmov 0.0   ;;  %vm978_vm0 = vmmov 0   ;;  %vm77_vm1 = vcmask 261120   ;;  %s1257_s0 = inlined_call_operand.vmem [shape: bf16[16,32], index: 0, kind: input, shape index: {}]   ;;  %s1258_s1 = inlined_call_operand.vmem [shape: bf16[32,32], index: 1, kind: input, shape index: {}]   ;;  %s1259_s2 = inlined_call_operand.vmem [shape: bf16[32,8], index: 2, kind: input, shape index: {}]   ;;  %s1260_s3 = inlined_call_operand.vmem [shape: bf16[8,32], index: 3, kind: input, shape index: {}]   ;;  %s1261_s4 = inlined_call_operand.vmem [shape: bf16[32,32], index: 4, kind: input, shape index: {}]   ;;  %s1262_s5 = inlined_call_operand.vmem [shape: bf16[32,8], index: 5, kind: input, shape index: {}]   ;;  %s1263_s6 = inlined_call_operand.vmem [shape: bf16[8,32], index: 6, kind: input, shape index: {}]   ;;  %s1264_s7 = inlined_call_operand.vmem [shape: f32[1,32], index: 7, kind: input, shape index: {}]   ;;  %s1265_s8 = inlined_call_operand.vmem [shape: bf16[32,128], index: 8, kind: input, shape index: {}]   ;;  %s1266_s9 = inlined_call_operand.vmem [shape: bf16[32,128], index: 9, kind: input, shape index: {}]   ;;  %s1267_s10 = inlined_call_operand.vmem [shape: bf16[1,128], index: 10, kind: input, shape index: {}]   ;;  %s1268_s11 = inlined_call_operand.vmem [shape: s32[16,1], index: 11, kind: input, shape index: {}]   ;;  %s1269_s12 = inlined_call_operand.vmem [shape: s32[16,1], index: 12, kind: input, shape index: {}]   ;;  %s1270_s13 = inlined_call_operand.hbm [shape: bf16[16,128], index: 13, kind: output, shape index: {0}]   ;;  %s1271_s14 = inlined_call_operand.vmem [shape: f32[16,128], index: 14, kind: output, shape index: {1}]   ;;  %s1272_s15 = inlined_call_operand.vmem [shape: f32[4], index: 15, kind: output, shape index: {2}]  }
   0x1   :  { %v898_v0 = vld [vmem:[%s1259_s2] sm:$0xff]   ;;  %821 = vmatprep.subr.bf16.mxu0 %v977_v1  ;;  %829 = vmatprep.subr.bf16.mxu1 %v977_v1  ;;  %v899_v2 = vld [vmem:[%s1259_s2 + $0x8] sm:$0xff]  }
   0x2   :  { %822 = vmatpush3.bf16.msra.mxu0 %v898_v0  ;;  %825 = vmatprep.mubr.msk.bf16.mxu0 %vm978_vm0, %v977_v1  ;;  %v900_v3 = vld [vmem:[%s1257_s0] sm:$0xff]  }
   0x3   :  { %823 = vmatprep.subr.bf16.mxu0 %v977_v1  ;;  %831 = vmatprep.mubr.msk.bf16.mxu1 %vm978_vm0, %v977_v1 }
   0x6   :  { %824 = vmatpush3.bf16.msra.mxu0 %v899_v2 }
   0x7   :  { %843 = vmatprep.subr.bf16.mxu0 %v977_v1 }
   0x9   :  { %826 = vmatmul.mubr.msk.bf16.vlgmr.msra.gmra.mrb[0].mxu0 %vm77_vm1, %v900_v3 }
   0xa   :  { %22 = vsyncpa [#allocation4], 0  ;;  %847 = vmatprep.mubr.msk.bf16.mxu0 %vm978_vm0, %v977_v1  ;;  %v123_v4 = vld [vmem:[%s1260_s3] sm:$0xf]  ;;  %vm128_vm2 = vcmask 1043456   ;;  %vm124_vm3 = vcmask 64512  }
   0xb   :  { %v130_v5 = vsel %vm128_vm2, %v123_v4, 0  ;;  %v901_v9 = vld [vmem:[%s1258_s1] sm:$0xff]   ;;  %v902_v12 = vld [vmem:[%s1258_s1 + $0x8] sm:$0xff]   ;;  %vm552_vm11 = vcmask 7168  }
   0xc   :  { %830 = vmatpush3.bf16.msra.mxu1 %v130_v5  ;;  %v308_v13 = vld [vmem:[%s1263_s6] sm:$0xf]  ;;  %v904_v16 = vld [vmem:[%s1262_s5 + $0x8] sm:$0xff]  }
   0xd   :  { %835 = vmatprep.subr.bf16.mxu1 %v977_v1  ;;  %v313_v14 = vsel %vm128_vm2, %v308_v13, 0  ;;  %v903_v15 = vld [vmem:[%s1262_s5] sm:$0xff]   ;;  %v906_v41 = vld [vmem:[%s1261_s4 + $0x8] sm:$0xff]  }
   0xe   :  { %844 = vmatpush3.bf16.msra.mxu0 %v903_v15  ;;  %v905_v39 = vld [vmem:[%s1261_s4] sm:$0xff]   ;;  %v909_v2 = vld [vmem:[%s1265_s8 + $0x8] sm:$0xff]  }
   0xf   :  { %845 = vmatprep.subr.bf16.mxu0 %v977_v1  ;;  %v907_v63 = vld [vmem:[%s1265_s8] sm:$0xff]  }
  0x10   :  { %v908_v0 = vld [vmem:[%s1266_s9] sm:$0xff]  }
  0x11   :  { %v779_v13 = vld [vmem:[%s1264_s7] ss:$0 sm:$0xff] }
  0x12   :  { %846 = vmatpush3.bf16.msra.mxu0 %v904_v16 }
  0x13   :  { %857 = vmatprep.subr.bf16.mxu0 %v977_v1 }
  0xdc   :  { %v115_v6 = vpop.f32.mrb[0].mxu0 }
  0xdd   :  { %v827_v7 = vpop.f32.mrb[1].mxu0 }
  0xde   :  { %v118_v8 = vpop.f32.mrb[2].mxu0 }
  0xdf   :  { %v122_v10 = vpack.c.bf16 %v118_v8, %v115_v6  ;;  %v828_v11 = vpop.f32.mrb[3].mxu0 }
  0xe1   :  { %832 = vmatmul.mubr.msk.bf16.vlgmr.msra.gmra.mrb[0].mxu1 %vm124_vm3, %v122_v10 }
  0xe2   :  { %836 = vmatpush3.bf16.msra.mxu1 %v901_v9  ;;  %839 = vmatprep.mubr.msk.bf16.mxu1 %vm978_vm0, %v977_v1 }
  0xe3   :  { %837 = vmatprep.subr.bf16.mxu1 %v977_v1 }
  0xe6   :  { %838 = vmatpush3.bf16.msra.mxu1 %v902_v12 }
  0xe7   :  { %851 = vmatprep.subr.bf16.mxu1 %v977_v1 }
  0xe9   :  { %840 = vmatmul.mubr.msk.bf16.vlgmr.msra.gmra.mrb[4].mxu1 %vm77_vm1, %v900_v3  ;;  %v910_v3 = vld [vmem:[%s1266_s9 + $0x8] sm:$0xff]  }
  0xea   :  { %852 = vmatpush3.bf16.msra.mxu1 %v313_v14  ;;  %853 = vmatprep.mubr.msk.bf16.mxu1 %vm978_vm0, %v977_v1 }
  0xeb   :  { %865 = vmatprep.subr.bf16.mxu1 %v977_v1 }
 0x1b4   :  { %v166_v17 = vpop.f32.mrb[0].mxu1 }
 0x1b5   :  { %v833_v18 = vpop.f32.mrb[1].mxu1  ;;  %v173_v21 = vmul.f32 2.0, %v166_v17 }
 0x1b6   :  { %v169_v19 = vpop.f32.mrb[2].mxu1  ;;  %v979_v18 = vmov 0  }
 0x1b7   :  { %v834_v20 = vpop.f32.mrb[3].mxu1  ;;  %v174_v23 = vmul.f32 2.0, %v169_v19  ;;  %897 = vset.pattern.permute.xlu1 %v979_v18  ;;  %896 = vset.pattern.permute.xlu0 %v979_v18  ;;  %v530_v19 = vlaneseq }
 0x1b9   :  { %v588_v20 = vshrl.u32 %v530_v19, 7 }
 0x1bc   :  { %v221_v22 = vpop.f32.mrb[4].mxu1 }
 0x1bd   :  { %v222_v24 = vadd.f32 %v221_v22, %v173_v21  ;;  %v841_v25 = vpop.f32.mrb[5].mxu1  ;;  %v585_v21 = vld [vmem:[%s1267_s10] sm:$0x1] }
 0x1be   :  { %v224_v26 = vpop.f32.mrb[6].mxu1  ;;  %v586_v22 = vunpack.c.l.bf16 %v585_v21 }
 0x1bf   :  { %v770_v27 = vmul.f32 -1.442695, %v222_v24  ;;  %v225_v28 = vadd.f32 %v224_v26, %v174_v23  ;;  %v842_v29 = vpop.f32.mrb[7].mxu1  ;;  %v589_v23 = vsub.s32 0, %v588_v20 }
 0x1c1   :  { %911 = vpow2.f32 %v770_v27  ;;  %v771_v30 = vmul.f32 -1.442695, %v225_v28  ;;  %v590_v25 = vrot.slane %v586_v22, %v589_v23 }
 0x1c3   :  { %913 = vpow2.f32 %v771_v30 }
 0x1cb   :  { %v912_v31 = vpop.eup %911 }
 0x1cc   :  { %v234_v32 = vadd.f32 1.0, %v912_v31 }
 0x1cd   :  { %v914_v33 = vpop.eup %913 }
 0x1ce   :  { %915 = vrcp.f32 %v234_v32  ;;  %v235_v34 = vadd.f32 1.0, %v914_v33 }
 0x1d0   :  { %917 = vrcp.f32 %v235_v34 }
 0x1d8   :  { %v916_v35 = vpop.eup %915 }
 0x1d9   :  { %v240_v37 = vmul.f32 %v916_v35, %v222_v24  ;;  %v1157_v24 = vand.u32 127, %v530_v19 }
 0x1da   :  { %v918_v36 = vpop.eup %917 }
 0x1db   :  { %v241_v38 = vmul.f32 %v918_v36, %v225_v28  ;;  %vm646_vm4 = vcmp.lt.s32.totalorder %v1157_v24, 3 }
 0x1dd   :  { %v242_v40 = vpack.c.bf16 %v241_v38, %v240_v37  ;;  %v1171_v38 = vld [vmem:[%s1268_s11 + $0x8] sm:$0xff] }
 0x1de   :  { %vm547_vm9 = vcmp.ne.s32.totalorder %v1171_v38, 4294967196 }
 0x1df   :  { %848 = vmatmul.mubr.msk.bf16.vlgmr.msra.gmra.mrb[4].mxu0 %vm77_vm1, %v242_v40 }
 0x1e0   :  { %858 = vmatpush3.bf16.msra.mxu0 %v905_v39  ;;  %861 = vmatprep.mubr.msk.bf16.mxu0 %vm978_vm0, %v977_v1  ;;  %v1177_v39 = vld [vmem:[%s1269_s12] sm:$0xff] }
 0x1e1   :  { %859 = vmatprep.subr.bf16.mxu0 %v977_v1  ;;  %vm685_vm13 = vcmp.ne.s32.totalorder %v1177_v39, 4294967196 }
 0x1e4   :  { %860 = vmatpush3.bf16.msra.mxu0 %v906_v41 }
 0x1e5   :  { %873 = vmatprep.subr.bf16.mxu0 %v977_v1 }
 0x1e7   :  { %862 = vmatmul.mubr.msk.bf16.vlgmr.msra.gmra.mrb[8].mxu0 %vm77_vm1, %v242_v40  ;;  %v1182_v40 = vld [vmem:[%s1268_s11] sm:$0xff]  ;;  %s980_s11 = smov [#allocation2]  }
 0x1e8   :  { %877 = vmatprep.mubr.msk.bf16.mxu0 %vm978_vm0, %v977_v1  ;;  %874 = vmatpush3.bf16.msra.mxu0 %v908_v0  ;;  %vm546_vm10 = vcmp.ne.s32.totalorder %v1182_v40, 4294967196 }
 0x1e9   :  { %875 = vmatprep.subr.bf16.mxu0 %v977_v1 }
 0x1ec   :  { %876 = vmatpush3.bf16.msra.mxu0 %v910_v3 }
 0x2b2   :  { %v300_v42 = vpop.f32.mrb[4].mxu0 }
 0x2b3   :  { %v849_v43 = vpop.f32.mrb[5].mxu0 }
 0x2b4   :  { %v303_v44 = vpop.f32.mrb[6].mxu0 }
 0x2b5   :  { %v307_v45 = vpack.c.bf16 %v303_v44, %v300_v42  ;;  %v850_v46 = vpop.f32.mrb[7].mxu0  ;;  %v1191_v42 = vld [vmem:[%s1269_s12 + $0x8] sm:$0xff]  ;;  %s732_s12 = sshll.u32 %s980_s11, 4  ;;  %s733_s12 = int_to_ptr.vmem [resolvable:$true] %s732_s12 }
 0x2b6   :  { %vm686_vm12 = vcmp.ne.s32.totalorder %v1191_v42, 4294967196  ;;  %s939_s16 = scalar_lea.vmem %s733_s12, 128  ;;  %p944_p1 = scmp.lt.s32.totalorder %s733_s12, %s733_s12 }
 0x2b7   :  { %854 = vmatmul.mubr.msk.bf16.vlgmr.msra.gmra.mrb[8].mxu1 %vm124_vm3, %v307_v45  ;;  %p940_p0 = scmp.ne.s32.totalorder %s733_s12, %s939_s16  ;;  %p945_p2 = scmp.lt.s32.totalorder %s939_s16, %s939_s16 }
 0x2b8   :  { %869 = vmatprep.mubr.msk.bf16.mxu1 %vm978_vm0, %v977_v1  ;;  %866 = vmatpush3.bf16.msra.mxu1 %v907_v63 }
 0x2b9   :  { %867 = vmatprep.subr.bf16.mxu1 %v977_v1  ;;  %p946_p3 = por %p945_p2, %p944_p1 }
 0x2ba   :  { %v404_v47 = vpop.f32.mrb[8].mxu0 }
 0x2bb   :  { %v863_v48 = vpop.f32.mrb[9].mxu0  ;;  %p947_p4 = pnand %p946_p3, %p940_p0 }
 0x2bc   :  { %v407_v49 = vpop.f32.mrb[10].mxu0  ;;  %868 = vmatpush3.bf16.msra.mxu1 %v909_v2 }
 0x2bd   :  { %v864_v50 = vpop.f32.mrb[11].mxu0 }
 0x38a   :  { %v349_v51 = vpop.f32.mrb[8].mxu1 }
 0x38b   :  { %v356_v52 = vmul.f32 2.0, %v349_v51  ;;  %v855_v53 = vpop.f32.mrb[9].mxu1 }
 0x38c   :  { %v352_v54 = vpop.f32.mrb[10].mxu1 }
 0x38d   :  { %v405_v55 = vadd.f32 %v404_v47, %v356_v52  ;;  %v357_v56 = vmul.f32 2.0, %v352_v54  ;;  %v856_v57 = vpop.f32.mrb[11].mxu1 }
 0x38f   :  { %v408_v58 = vadd.f32 %v407_v49, %v357_v56  ;;  %v411_v59 = vmul.f32 %v405_v55, %v405_v55 }
 0x391   :  { %v413_v60 = vsel %vm77_vm1, %v411_v59, 0.0  ;;  %v412_v61 = vmul.f32 %v408_v58, %v408_v58 }
 0x392   :  { %414 = vadd.xlane.f32.xlu0 %v413_v60 }
 0x393   :  { %v416_v62 = vsel %vm77_vm1, %v412_v61, 0.0 }
 0x396   :  { %417 = vadd.xlane.f32.xlu0 %v416_v62 }
 0x41f   :  { %v415_v4 = vpop.xlane.xlu0 %414 }
 0x420   :  { %v420_v5 = vmul.f32 0.03125, %v415_v4  ;;  %v785_v4 = vsel %vm546_vm10, 1.0, %v977_v1 }
 0x422   :  { %v422_v6 = vadd.f32 1e-06, %v420_v5  ;;  %v786_v5 = vsel %vm547_vm9, 1.0, %v977_v1 }
 0x423   :  { %v418_v7 = vpop.xlane.xlu0 %417 }
 0x424   :  { %919 = vrsqrt.f32 %v422_v6  ;;  %v421_v8 = vmul.f32 0.03125, %v418_v7  ;;  %v569_v6 = vsel %vm552_vm11, %v785_v4, 0.0  ;;  %v570_v7 = vsel %vm552_vm11, %v786_v5, 0.0 }
 0x426   :  { %v423_v9 = vadd.f32 1e-06, %v421_v8  ;;  %v571_v8 = vadd.f32 %v570_v7, %v569_v6 }
 0x428   :  { %921 = vrsqrt.f32 %v423_v9  ;;  %v790_v9 = vsel %vm685_vm13, 1.0, %v977_v1 }
 0x42e   :  { %v920_v10 = vpop.eup %919 }
 0x42f   :  { %v426_v11 = vmul.f32 %v920_v10, %v405_v55  ;;  %v791_v10 = vsel %vm686_vm12, 1.0, %v977_v1 }
 0x431   :  { %v435_v15 = vmul.f32 %v779_v13, %v426_v11  ;;  %v707_v11 = vsel %vm552_vm11, %v790_v9, 0.0 }
 0x432   :  { %v922_v12 = vpop.eup %921 }
 0x433   :  { %v427_v14 = vmul.f32 %v922_v12, %v408_v58  ;;  %v708_v12 = vsel %vm552_vm11, %v791_v10, 0.0 }
 0x435   :  { %v436_v16 = vmul.f32 %v779_v13, %v427_v14  ;;  %v709_v13 = vadd.f32 %v708_v12, %v707_v11 }
 0x437   :  { %v437_v17 = vpack.c.bf16 %v436_v16, %v435_v15 }
 0x439   :  { %870 = vmatmul.mubr.msk.bf16.vlgmr.msra.gmra.mrb[12].mxu1 %vm77_vm1, %v437_v17  ;;  %878 = vmatmul.mubr.msk.bf16.vlgmr.msra.gmra.mrb[12].mxu0 %vm77_vm1, %v437_v17 }
 0x50c   :  { %v491_v26 = vpop.f32.mrb[12].mxu1  ;;  %v637_v27 = vpop.f32.mrb[12].mxu0 }
 0x50d   :  { %v638_v28 = vadd.f32 %v637_v27, %v590_v25  ;;  %510 = vmax.xlane.f32.xlu1 %v491_v26  ;;  %v871_v29 = vpop.f32.mrb[13].mxu1  ;;  %v879_v30 = vpop.f32.mrb[13].mxu0 }
 0x50e   :  { %v494_v31 = vpop.f32.mrb[14].mxu1  ;;  %v640_v32 = vpop.f32.mrb[14].mxu0 }
 0x50f   :  { %644 = vst [vmem:[%s1271_s14] sm:$0xff] %v638_v28  ;;  %v641_v33 = vadd.f32 %v640_v32, %v590_v25  ;;  %v872_v34 = vpop.f32.mrb[15].mxu1  ;;  %v880_v35 = vpop.f32.mrb[15].mxu0  ;;  %v647_v36 = vsel %vm646_vm4, %v638_v28, -1e+30  ;;  %v797_v37 = vpack.c.bf16 %v494_v31, %v491_v26 }
 0x510   :  { %651 = vmax.xlane.f32.xlu0 %v647_v36 }
 0x511   :  { %645 = vst [vmem:[%s1271_s14 + $0x8] sm:$0xff] %v641_v33  ;;  %512 = vmax.xlane.f32.xlu1 %v494_v31  ;;  %798 = vst [vmem:[#allocation2] sm:$0xff] %v797_v37   ;;  %v648_v41 = vsel %vm646_vm4, %v641_v33, -1e+30 }
 0x522   :  { %536 = vperm.xlu1 %897, %v1171_v38  }
 0x526   :  { %672 = vperm.xlu1 %897, %v1177_v39   ;;  %533 = vperm.xlu0 %896, %v1182_v40  }
 0x54a   :  { %653 = vmax.xlane.f32.xlu1 %v648_v41 }
 0x55b   :  { %675 = vperm.xlu1 %897, %v1191_v42  }
 0x59a   :  { %v1194_v43 = vpop.xlane.xlu1 %510 }
 0x59b   :  { %v514_v44 = vsub.f32 %v491_v26, %v1194_v43 }
 0x59d   :  { %v516_v45 = vmul.f32 1.442695, %v514_v44  ;;  %v1197_v46 = vpop.xlane.xlu0 %651 }
 0x59e   :  { %v655_v47 = vsub.f32 %v647_v36, %v1197_v46  ;;  %v1200_v48 = vpop.xlane.xlu1 %512 }
 0x59f   :  { %923 = vpow2.f32 %v516_v45  ;;  %v515_v49 = vsub.f32 %v494_v31, %v1200_v48 }
 0x5a0   :  { %v657_v50 = vmul.f32 1.442695, %v655_v47 }
 0x5a1   :  { %v518_v51 = vmul.f32 1.442695, %v515_v49 }
 0x5a2   :  { %925 = vpow2.f32 %v657_v50  ;;  %v537_v52 = vpop.permute.xlu1 %536 }
 0x5a3   :  { %927 = vpow2.f32 %v518_v51  ;;  %vm539_vm5 = vcmp.eq.s32.totalorder %v1157_v24, %v537_v52 }
 0x5a4   :  { %v541_v53 = vsel %vm539_vm5, %v494_v31, 0.0 }
 0x5a5   :  { %v534_v62 = vpop.permute.xlu0 %533 }
 0x5a6   :  { %v673_v55 = vpop.permute.xlu1 %672  ;;  %vm538_vm7 = vcmp.eq.s32.totalorder %v1157_v24, %v534_v62 }
 0x5a7   :  { %vm677_vm6 = vcmp.eq.s32.totalorder %v1157_v24, %v673_v55  ;;  %v540_v0 = vsel %vm538_vm7, %v491_v26, 0.0 }
 0x5a8   :  { %v679_v58 = vsel %vm677_vm6, %v647_v36, 0.0 }
 0x5a9   :  { %v924_v54 = vpop.eup %923 }
 0x5aa   :  { %520 = vadd.xlane.f32.xlu1 %v924_v54 }
 0x5ac   :  { %v926_v56 = vpop.eup %925 }
 0x5ad   :  { %v928_v57 = vpop.eup %927 }
 0x5ae   :  { %522 = vadd.xlane.f32.xlu0 %v928_v57  ;;  %661 = vadd.xlane.f32.xlu1 %v926_v56 }
 0x5b2   :  { %681 = vadd.xlane.f32.xlu0 %v679_v58 }
 0x5d7   :  { %v654_v59 = vpop.xlane.xlu1 %653 }
 0x5d8   :  { %v656_v60 = vsub.f32 %v648_v41, %v654_v59 }
 0x5da   :  { %v659_v61 = vmul.f32 1.442695, %v656_v60 }
 0x5db   :  { %v676_v2 = vpop.permute.xlu1 %675 }
 0x5dc   :  { %929 = vpow2.f32 %v659_v61  ;;  %vm678_vm8 = vcmp.eq.s32.totalorder %v1157_v24, %v676_v2 }
 0x5dd   :  { %v680_v3 = vsel %vm678_vm8, %v648_v41, 0.0 }
 0x5e6   :  { %v930_v63 = vpop.eup %929 }
 0x5e7   :  { %663 = vadd.xlane.f32.xlu1 %v930_v63 }
 0x5eb   :  { %542 = vadd.xlane.f32.xlu1 %v540_v0 }
 0x5ef   :  { %544 = vadd.xlane.f32.xlu1 %v541_v53 }
 0x5f3   :  { %683 = vadd.xlane.f32.xlu1 %v680_v3 }
 0x5f7   :  { %572 = vadd.xlane.f32.xlu1 %v571_v8 }
 0x5fb   :  { %710 = vadd.xlane.f32.xlu1 %v709_v13 }
 0x637   :  { %v521_v14 = vpop.xlane.xlu1 %520 }
 0x638   :  { %931 = vlog2.f32 %v521_v14 }
 0x63b   :  { %v523_v15 = vpop.xlane.xlu0 %522  ;;  %v662_v16 = vpop.xlane.xlu1 %661 }
 0x63c   :  { %933 = vlog2.f32 %v523_v15 }
 0x63d   :  { %935 = vlog2.f32 %v662_v16 }
 0x63f   :  { %v682_v32 = vpop.xlane.xlu0 %681 }
 0x642   :  { %v932_v17 = vpop.eup %931 }
 0x643   :  { %v525_v18 = vmul.f32 0.6931472, %v932_v17 }
 0x645   :  { %v528_v1 = vadd.f32 %v525_v18, %v1194_v43 }
 0x646   :  { %v934_v19 = vpop.eup %933 }
 0x647   :  { %v936_v21 = vpop.eup %935  ;;  %v527_v22 = vmul.f32 0.6931472, %v934_v19 }
 0x648   :  { %v666_v23 = vmul.f32 0.6931472, %v936_v21 }
 0x649   :  { %v529_v26 = vadd.f32 %v527_v22, %v1200_v48 }
 0x64a   :  { %v669_v27 = vadd.f32 %v666_v23, %v1197_v46 }
 0x64c   :  { %v687_v34 = vsub.f32 %v669_v27, %v682_v32 }
 0x64e   :  { %v689_v40 = vsel %vm685_vm13, %v687_v34, 0.0 }
 0x64f   :  { %v691_v38 = vsel %vm552_vm11, %v689_v40, 0.0 }
 0x674   :  { %v664_v20 = vpop.xlane.xlu1 %663 }
 0x675   :  { %937 = vlog2.f32 %v664_v20 }
 0x678   :  { %v543_v24 = vpop.xlane.xlu1 %542 }
 0x679   :  { %v548_v25 = vsub.f32 %v528_v1, %v543_v24 }
 0x67b   :  { %v550_v29 = vsel %vm546_vm10, %v548_v25, 0.0 }
 0x67c   :  { %v545_v28 = vpop.xlane.xlu1 %544  ;;  %v553_v36 = vsel %vm552_vm11, %v550_v29, 0.0 }
 0x67d   :  { %v549_v30 = vsub.f32 %v529_v26, %v545_v28 }
 0x67f   :  { %v938_v31 = vpop.eup %937  ;;  %v551_v33 = vsel %vm547_vm9, %v549_v30, 0.0 }
 0x680   :  { %v668_v35 = vmul.f32 0.6931472, %v938_v31  ;;  %v554_v37 = vsel %vm552_vm11, %v551_v33, 0.0  ;;  %v684_v44 = vpop.xlane.xlu1 %683 }
 0x681   :  { %v555_v41 = vadd.f32 %v554_v37, %v553_v36 }
 0x682   :  { %v670_v43 = vadd.f32 %v668_v35, %v654_v59 }
 0x683   :  { %556 = vadd.xlane.f32.xlu0 %v555_v41 }
 0x684   :  { %v688_v45 = vsub.f32 %v670_v43, %v684_v44 }
 0x686   :  { %v690_v46 = vsel %vm686_vm12, %v688_v45, 0.0 }
 0x687   :  { %v692_v47 = vsel %vm552_vm11, %v690_v46, 0.0 }
 0x688   :  { %v693_v48 = vadd.f32 %v692_v47, %v691_v38 }
 0x68a   :  { %694 = vadd.xlane.f32.xlu0 %v693_v48 }
 0x68b   :  { %950 = shalt.err (!%p947_p4)
}
 0x68c   :  { %s951_s4 = scalar_lea.hbm %s1270_s13, 128 }
 0x68d   :  { %p952_p5 = scmp.ne.s32.totalorder %s1270_s13, %s951_s4  ;;  %p955_p6 = scmp.lt.u32.totalorder %s951_s4, %s1270_s13 }
 0x68f   :  { %p957_p7 = pnand %p955_p6, %p952_p5 }
 0x691   :  { %960 = shalt.err (!%p957_p7)
}
 0x692   :  { %s981_s23 = smov 64   ;;  %s982_s2 = smov 4   ;;  %v573_v39 = vpop.xlane.xlu1 %572 }
 0x693   :  { %738 = dma.vmem_to_hbm [thread:$0]  %s733_s12, 128, %s1270_s13, [#allocation3], %s981_s23, %s981_s23, %s982_s2   ;;  %v574_v42 = vrot.slane %v573_v39, 4 }
 0x694   :  { %s747_s7 = sshll.u32 %s1272_s15, 4  ;;  %s748_s7 = int_to_ptr.vmem [resolvable:$true] %s747_s7 }
 0x695   :  { %v575_v49 = vadd.f32 %v574_v42, %v573_v39  ;;  %s961_s26 = scalar_lea.vmem %s748_s7, 16  ;;  %p966_p9 = scmp.lt.s32.totalorder %s748_s7, %s748_s7 }
 0x696   :  { %v711_v50 = vpop.xlane.xlu1 %710  ;;  %p962_p8 = scmp.ne.s32.totalorder %s748_s7, %s961_s26  ;;  %p967_p10 = scmp.lt.s32.totalorder %s961_s26, %s961_s26 }
 0x697   :  { %v712_v51 = vrot.slane %v711_v50, 4  ;;  %v576_v52 = vrot.slane %v575_v49, 2 }
 0x698   :  { %p968_p11 = por %p967_p10, %p966_p9 }
 0x699   :  { %v713_v56 = vadd.f32 %v712_v51, %v711_v50  ;;  %v577_v57 = vadd.f32 %v576_v52, %v575_v49 }
 0x69a   :  { %p969_p12 = pnand %p968_p11, %p962_p8 }
 0x69b   :  { %v714_v59 = vrot.slane %v713_v56, 2  ;;  %v578_v63 = vrot.slane %v577_v57, 1 }
 0x69d   :  { %v715_v3 = vadd.f32 %v714_v59, %v713_v56  ;;  %v579_v6 = vadd.f32 %v578_v63, %v577_v57 }
 0x69f   :  { %v716_v8 = vrot.slane %v715_v3, 1 }
 0x6a1   :  { %v717_v11 = vadd.f32 %v716_v8, %v715_v3 }
 0x710   :  { %v557_v53 = vpop.xlane.xlu0 %556 }
 0x711   :  { %v558_v54 = vrot.slane %v557_v53, 4 }
 0x713   :  { %v559_v55 = vadd.f32 %v558_v54, %v557_v53 }
 0x715   :  { %v560_v58 = vrot.slane %v559_v55, 2 }
 0x717   :  { %v695_v60 = vpop.xlane.xlu0 %694  ;;  %v561_v61 = vadd.f32 %v560_v58, %v559_v55 }
 0x718   :  { %v696_v62 = vrot.slane %v695_v60, 4 }
 0x719   :  { %v562_v0 = vrot.slane %v561_v61, 1 }
 0x71a   :  { %v697_v2 = vadd.f32 %v696_v62, %v695_v60 }
 0x71b   :  { %v563_v4 = vadd.f32 %v562_v0, %v561_v61 }
 0x71c   :  { %v698_v5 = vrot.slane %v697_v2, 2 }
 0x71d   :  { %881 = vpush %v563_v4 }
 0x71e   :  { %v699_v7 = vadd.f32 %v698_v5, %v697_v2  ;;  %883 = vpush %v579_v6 }
 0x720   :  { %v700_v9 = vrot.slane %v699_v7, 1 }
 0x722   :  { %v701_v10 = vadd.f32 %v700_v9, %v699_v7 }
 0x724   :  { %885 = vpush %v701_v10 }
 0x725   :  { %887 = vpush %v717_v11 }
 0x74e   :  { %s882_s13 = spop %881 }
 0x74f   :  { %720 = sst [smem:[#allocation5]] %s882_s13  ;;  %s884_s0 = spop %883 }
 0x750   :  { %722 = sst [smem:[#allocation5 + $0x1]] %s884_s0 }
 0x755   :  { %s886_s3 = spop %885 }
 0x756   :  { %724 = sst [smem:[#allocation5 + $0x2]] %s886_s3  ;;  %s888_s10 = spop %887 }
 0x757   :  { %726 = sst [smem:[#allocation5 + $0x3]] %s888_s10 }
 0x758   :  { %972 = shalt.err (!%p969_p12)
}
 0x759   :  { %s983_s27 = smov [#allocation5]  }
 0x75a   :  { %750 = dma.smem_to_vmem %s983_s27, 16, %s748_s7, [#allocation4]  }
 0x75b   :  { %973 = dma.done.wait [#allocation3], 128  }
 0x75c   :  { %974 = vsyncadd [#allocation3], 4294967168 }
 0x75d   :  { %975 = dma.done.wait [#allocation4], 16  }
 0x75e   :  { %976 = vsyncadd [#allocation4], 4294967280 }
 0x75f   :  { %759 = sfence }
 0x760   :  { %760 = vsyncpa [#allocation3], 1 }
 0x761   :  { %761 = vsyncpa [#allocation4], 1 }

</bundles_post_ra>
